<compile_context>
chip_gen: v5e
topology: v5e:2x2
jax: 0.10.0
libtpu: 0.0.40
codegen_flags: <defaults>
</compile_context>

<pallas_src>
import numpy as np
import jax
import jax.numpy as jnp
from jax.experimental import pallas as pl
from jax.experimental.pallas import tpu as pltpu


# ----------------------------------------------------------------------------
# Graph construction (glue, plain numpy): normalized adjacency for the board.
# ----------------------------------------------------------------------------
def build_norm_adj(board_size: int) -> np.ndarray:
    n = board_size * board_size
    A = np.zeros((n, n), dtype=np.float32)
    for r in range(board_size):
        for c in range(board_size):
            i = r * board_size + c
            for dr, dc in ((1, 0), (-1, 0), (0, 1), (0, -1)):
                rr, cc = r + dr, c + dc
                if 0 <= rr < board_size and 0 <= cc < board_size:
                    A[i, rr * board_size + cc] = 1.0
    A = A + np.eye(n, dtype=np.float32)          # GCNConv adds self-loops
    deg = A.sum(axis=1)
    dinv = 1.0 / np.sqrt(deg)
    return (dinv[:, None] * A * dinv[None, :]).astype(np.float32)  # symmetric


# ----------------------------------------------------------------------------
# Fused Pallas kernel (all GCN layers + policy / value heads, one call)
# ----------------------------------------------------------------------------
def make_gcn_kernel(layers_meta, BN, c_last, wht_off, hb_off, pool_off):
    def kernel(x_ref, a_ref, col_ref, mat_ref, out_ref):
        a = a_ref[...]                           # (BN, BN) f32, symmetric block-diag
        feats = x_ref[...]                       # (Cin0, BN) f32, transposed layout

        for lm in layers_meta:
            cin, cout = lm["cin"], lm["cout"]
            bias = col_ref[lm["b_off"]:lm["b_off"] + cout, :]        # (Cout, 1) f32
            if lm["kind"] == "col":
                # Cin == 1: aggregate BEFORE expanding channels ((A@X)@W == A@(X@W));
                # one single-row f32 MXU pass instead of a (Cout, BN) @ (BN, BN) pass.
                agg1 = jnp.dot(feats, a, preferred_element_type=jnp.float32)  # (1, BN)
                w = col_ref[lm["w_off"]:lm["w_off"] + cout, :]       # (Cout, 1) f32
                agg = w * agg1                                       # VPU outer product
            else:
                w = mat_ref[lm["w_off"]:lm["w_off"] + cout, 0:cin]   # (Cout, Cin) bf16
                t = jnp.dot(w, feats.astype(jnp.bfloat16),
                            preferred_element_type=jnp.float32)      # (Cout, BN)
                # A symmetric  =>  (A @ (XW))^T == (XW)^T @ A ; aggregation kept f32
                agg = jnp.dot(t, a, preferred_element_type=jnp.float32)
            feats = jnp.maximum(agg + bias, 0.0)                     # bias + ReLU in f32

        # fused heads: one (2, C) @ (C, BN) matmul; row 0 = policy, row 1 = value pre-pool
        wht = mat_ref[wht_off:wht_off + 2, 0:c_last]                 # (2, C) bf16
        hw = jnp.dot(wht, feats.astype(jnp.bfloat16),
                     preferred_element_type=jnp.float32)             # (2, BN) f32
        hwb = hw + col_ref[hb_off:hb_off + 2, :]                     # + [bp, bv] column
        out_ref[0:1, :] = hwb[0:1, :]                                # lane-dense policy row
        # per-graph mean pool as ONE bf16 MXU pass (1/N exact in bf16); valid pooling
        # columns sum to 1, so the pre-added bv passes through; padded columns are 0.
        pool = mat_ref[pool_off:pool_off + BN, :]                    # (BN, BN) bf16
        out_ref[1:2, :] = jnp.dot(hwb[1:2, :].astype(jnp.bfloat16), pool,
                                  preferred_element_type=jnp.float32)

    return kernel


# ----------------------------------------------------------------------------
# Wrapper
# ----------------------------------------------------------------------------
def gcn_net_forward(X, a_hat, gcn_ws, gcn_bs, wp, bp, wv, bv, board_size):
    B = int(X.shape[0])
    N = board_size ** 2
    BN = B * N
    L = len(gcn_ws)
    dims = [int(gcn_ws[0].shape[0])] + [int(w.shape[1]) for w in gcn_ws]
    c_last = dims[-1]

    # transposed feature layout: channels on sublanes, B*N nodes on lanes
    x_t = (jnp.asarray(X, jnp.float32).reshape(B, N, dims[0])
           .transpose(2, 0, 1).reshape(dims[0], BN))

    # block-diagonal normalized adjacency (PyG batched graph), kept in f32 for accuracy
    a_np = np.asarray(a_hat, dtype=np.float32)
    a_blk = jnp.asarray(np.kron(np.eye(B, dtype=np.float32), a_np))

    # ---- pack parameters into two slabs (f32 columns + bf16 matrices) -------
    col_parts, mat_parts = [], []
    col_off, mat_off = 0, 0
    wmax = max([BN, c_last] + [dims[l] for l in range(L) if dims[l] > 1])

    def _add_col(arr):                       # tiny f32 column -> col slab
        nonlocal col_off
        arr = np.asarray(arr, np.float32).reshape(-1, 1)
        off, rows = col_off, arr.shape[0]
        pad = (-rows) % 8                    # f32 sublane tile = 8
        col_parts.append(np.pad(arr, ((0, pad), (0, 0))))
        col_off += rows + pad
        return off

    def _add_mat(arr):                       # matrix -> lane-dense bf16 slab
        nonlocal mat_off
        arr = np.asarray(arr, np.float32)
        off, (rows, cols) = mat_off, arr.shape
        rpad = (-rows) % 16                  # bf16 sublane tile = 16
        mat_parts.append(np.pad(arr, ((0, rpad), (0, wmax - cols))))
        mat_off += rows + rpad
        return off

    layers_meta = []
    for l in range(L):
        w_t = np.asarray(gcn_ws[l], np.float32).T                    # (Cout, Cin)
        b_c = np.asarray(gcn_bs[l], np.float32).reshape(-1, 1)       # (Cout, 1)
        cin_l, cout_l = dims[l], dims[l + 1]
        if cin_l == 1:
            layers_meta.append(dict(kind="col", cin=cin_l, cout=cout_l,
                                    w_off=_add_col(w_t), b_off=_add_col(b_c)))
        else:
            layers_meta.append(dict(kind="mat", cin=cin_l, cout=cout_l,
                                    w_off=_add_mat(w_t), b_off=_add_col(b_c)))

    wht = np.concatenate([np.asarray(wp, np.float32),
                          np.asarray(wv, np.float32)], axis=1).T     # (2, C_last)
    wht_off = _add_mat(wht)
    hb_off = _add_col(np.concatenate([np.asarray(bp, np.float32).reshape(-1),
                                      np.asarray(bv, np.float32).reshape(-1)]))
    pool_np = np.zeros((BN, BN), np.float32)                         # zero-padded pooling
    for b_i in range(B):
        pool_np[b_i * N:(b_i + 1) * N, b_i] = 1.0 / N                # exact in bf16
    pool_off = _add_mat(pool_np)

    col_slab = jnp.asarray(np.concatenate(col_parts, axis=0))                      # f32 (Rc, 1)
    mat_slab = jnp.asarray(np.concatenate(mat_parts, axis=0), dtype=jnp.bfloat16)  # bf16 (Rm, wmax)

    # advisory cost estimate
    flops = 0
    for lm in layers_meta:
        if lm["kind"] == "col":
            flops += 2 * BN * BN + 2 * lm["cout"] * BN
        else:
            flops += 2 * lm["cout"] * lm["cin"] * BN + 2 * lm["cout"] * BN * BN
    flops += 2 * 2 * c_last * BN + 2 * BN * BN
    bytes_accessed = int(x_t.size * 4 + a_blk.size * 4 + col_slab.size * 4
                         + mat_slab.size * 2 + 2 * BN * 4)
    ce = pl.CostEstimate(flops=int(flops), transcendentals=0, bytes_accessed=bytes_accessed)

    vmem = pl.BlockSpec(memory_space=pltpu.MemorySpace.VMEM)
    out = pl.pallas_call(
        make_gcn_kernel(layers_meta, BN, c_last, wht_off, hb_off, pool_off),
        out_shape=jax.ShapeDtypeStruct((2, BN), jnp.float32),   # row 0 policy, row 1 values
        in_specs=[vmem, vmem, vmem, vmem],
        out_specs=vmem,
        cost_estimate=ce,
    )(x_t, a_blk, col_slab, mat_slab)

    policies = out[0].reshape(B, N)          # contiguous reshape (free) == _policy_header
    values = out[1, 0:B].reshape(B, 1)       # row 1 lanes [0:B]
    return values, policies                  # matches torch forward return order


# ----------------------------------------------------------------------------
# Deterministic parameter init (synthetic; shapes match the torch module)
# ----------------------------------------------------------------------------
def init_params(key, feature_dim, gcn_layers):
    dims = [feature_dim] + list(gcn_layers)
    gcn_ws, gcn_bs = [], []
    for i in range(len(gcn_layers)):
        key, k = jax.random.split(key)
        fan_in, fan_out = dims[i], dims[i + 1]
        std = np.sqrt(2.0 / (fan_in + fan_out))            # glorot-normal-ish
        gcn_ws.append(jax.random.normal(k, (fan_in, fan_out), jnp.float32) * std)
        gcn_bs.append(jnp.zeros((1, fan_out), jnp.float32))
    hid = gcn_layers[-1]
    key, kp, kv = jax.random.split(key, 3)
    std_fc = np.sqrt(2.0 / (hid + 1))                      # xavier_normal_
    wp = jax.random.normal(kp, (hid, 1), jnp.float32) * std_fc
    wv = jax.random.normal(kv, (hid, 1), jnp.float32) * std_fc
    bp = jnp.zeros((1, 1), jnp.float32)
    bv = jnp.zeros((1, 1), jnp.float32)
    return gcn_ws, gcn_bs, wp, bp, wv, bv


# ----------------------------------------------------------------------------
if __name__ == "__main__":
    board_size = 8           # N = 64 nodes per graph
    feature_dim = 1          # node attrs are scalars (board occupancy)
    gcn_layers = [32, 32]
    batch = 2                # B*N = 128 -> one full lane tile

    key = jax.random.PRNGKey(0)
    key, kx = jax.random.split(key)
    X = jax.random.normal(kx, (batch, board_size, board_size), jnp.float32)

    a_hat = build_norm_adj(board_size)
    gcn_ws, gcn_bs, wp, bp, wv, bv = init_params(key, feature_dim, gcn_layers)

    values, policies = gcn_net_forward(
        X, a_hat, gcn_ws, gcn_bs, wp, bp, wv, bv, board_size
    )
    jax.block_until_ready((values, policies))

    # Reference in plain JAX f32 (same math).  Kernel uses bf16 weights on the MXU
    # with f32 accumulation and f32 adjacency/aggregation, so the tolerance is
    # tightened vs v1 (5e-2 -> 2e-2).
    a_j = jnp.asarray(a_hat)
    feats = X.reshape(batch, board_size ** 2, 1)
    for w, b in zip(gcn_ws, gcn_bs):
        feats = jax.nn.relu(jnp.einsum("nm,bmc->bnc", a_j, feats) @ w + b)
    ref_pol = (feats @ wp + bp).reshape(batch, board_size ** 2)
    ref_val = jnp.mean(feats, axis=1) @ wv + bv
    assert values.shape == (batch, 1) and policies.shape == (batch, board_size ** 2)
    np.testing.assert_allclose(np.asarray(policies), np.asarray(ref_pol), rtol=2e-2, atol=2e-2)
    np.testing.assert_allclose(np.asarray(values), np.asarray(ref_val), rtol=2e-2, atol=2e-2)

    print("KERNEL_OK")
</pallas_src>

<mosaic_0001>
module attributes {stable_mosaic.version = 11 : i64} {
  func.func @kernel(%arg0: memref<1x128xf32, #tpu.memory_space<vmem>>, %arg1: memref<128x128xf32, #tpu.memory_space<vmem>>, %arg2: memref<104x1xf32, #tpu.memory_space<vmem>>, %arg3: memref<176x128xbf16, #tpu.memory_space<vmem>>, %arg4: memref<2x128xf32, #tpu.memory_space<vmem>>) attributes {dimension_semantics = [], scalar_prefetch = 0 : i64, scratch_operands = 0 : i64, tpu.core_type = #tpu.core_type<tc>} {
    %c0 = arith.constant 0 : index
    %c0_0 = arith.constant 0 : index
    %0 = vector.load %arg1[%c0, %c0_0] : memref<128x128xf32, #tpu.memory_space<vmem>>, vector<128x128xf32>
    %c0_1 = arith.constant 0 : index
    %c0_2 = arith.constant 0 : index
    %1 = vector.load %arg0[%c0_1, %c0_2] : memref<1x128xf32, #tpu.memory_space<vmem>>, vector<1x128xf32>
    %c32 = arith.constant 32 : index
    %c0_3 = arith.constant 0 : index
    %2 = vector.load %arg2[%c32, %c0_3] : memref<104x1xf32, #tpu.memory_space<vmem>>, vector<32x1xf32>
    %cst = arith.constant dense<0.000000e+00> : vector<1x128xf32>
    %3 = tpu.matmul %1, %0, %cst {dimension_numbers = #tpu.dot_dimension_numbers<[1], [0], [0], [1], [0, 0, 1, 1], [], []>} : vector<1x128xf32>, vector<128x128xf32>, vector<1x128xf32> -> vector<1x128xf32>
    %c0_4 = arith.constant 0 : index
    %c0_5 = arith.constant 0 : index
    %4 = vector.load %arg2[%c0_4, %c0_5] : memref<104x1xf32, #tpu.memory_space<vmem>>, vector<32x1xf32>
    %5 = vector.broadcast %4 : vector<32x1xf32> to vector<32x128xf32>
    %6 = vector.broadcast %3 : vector<1x128xf32> to vector<32x128xf32>
    %7 = arith.mulf %5, %6 : vector<32x128xf32>
    %8 = vector.broadcast %2 : vector<32x1xf32> to vector<32x128xf32>
    %9 = arith.addf %7, %8 : vector<32x128xf32>
    %cst_6 = arith.constant 0.000000e+00 : f32
    %10 = vector.broadcast %cst_6 : f32 to vector<32x128xf32>
    %11 = arith.maximumf %9, %10 : vector<32x128xf32>
    %c64 = arith.constant 64 : index
    %c0_7 = arith.constant 0 : index
    %12 = vector.load %arg2[%c64, %c0_7] : memref<104x1xf32, #tpu.memory_space<vmem>>, vector<32x1xf32>
    %c0_8 = arith.constant 0 : index
    %c0_9 = arith.constant 0 : index
    %13 = vector.load %arg3[%c0_8, %c0_9] : memref<176x128xbf16, #tpu.memory_space<vmem>>, vector<32x32xbf16>
    %14 = arith.truncf %11 : vector<32x128xf32> to vector<32x128xbf16>
    %cst_10 = arith.constant dense<0.000000e+00> : vector<32x128xf32>
    %15 = tpu.matmul %13, %14, %cst_10 {dimension_numbers = #tpu.dot_dimension_numbers<[1], [0], [0], [1], [0, 0, 1, 1], [], []>} : vector<32x32xbf16>, vector<32x128xbf16>, vector<32x128xf32> -> vector<32x128xf32>
    %cst_11 = arith.constant dense<0.000000e+00> : vector<32x128xf32>
    %16 = tpu.matmul %15, %0, %cst_11 {dimension_numbers = #tpu.dot_dimension_numbers<[1], [0], [0], [1], [0, 0, 1, 1], [], []>} : vector<32x128xf32>, vector<128x128xf32>, vector<32x128xf32> -> vector<32x128xf32>
    %17 = vector.broadcast %12 : vector<32x1xf32> to vector<32x128xf32>
    %18 = arith.addf %16, %17 : vector<32x128xf32>
    %cst_12 = arith.constant 0.000000e+00 : f32
    %19 = vector.broadcast %cst_12 : f32 to vector<32x128xf32>
    %20 = arith.maximumf %18, %19 : vector<32x128xf32>
    %c32_13 = arith.constant 32 : index
    %c0_14 = arith.constant 0 : index
    %21 = vector.load %arg3[%c32_13, %c0_14] : memref<176x128xbf16, #tpu.memory_space<vmem>>, vector<2x32xbf16>
    %22 = arith.truncf %20 : vector<32x128xf32> to vector<32x128xbf16>
    %cst_15 = arith.constant dense<0.000000e+00> : vector<2x128xf32>
    %23 = tpu.matmul %21, %22, %cst_15 {dimension_numbers = #tpu.dot_dimension_numbers<[1], [0], [0], [1], [0, 0, 1, 1], [], []>} : vector<2x32xbf16>, vector<32x128xbf16>, vector<2x128xf32> -> vector<2x128xf32>
    %c96 = arith.constant 96 : index
    %c0_16 = arith.constant 0 : index
    %24 = vector.load %arg2[%c96, %c0_16] : memref<104x1xf32, #tpu.memory_space<vmem>>, vector<2x1xf32>
    %25 = vector.broadcast %24 : vector<2x1xf32> to vector<2x128xf32>
    %26 = arith.addf %23, %25 : vector<2x128xf32>
    %27 = vector.extract_strided_slice %26 {offsets = [0, 0], sizes = [1, 128], strides = [1, 1]} : vector<2x128xf32> to vector<1x128xf32>
    %c0_17 = arith.constant 0 : index
    %c0_18 = arith.constant 0 : index
    %28 = vector.load %arg4[%c0_17, %c0_18] : memref<2x128xf32, #tpu.memory_space<vmem>>, vector<1x128xf32>
    tpu.vector_store %arg4[%c0_17, %c0_18], %27 {strides = array<i32>} : memref<2x128xf32, #tpu.memory_space<vmem>>, vector<1x128xf32>,
    %c48 = arith.constant 48 : index
    %c0_19 = arith.constant 0 : index
    %29 = vector.load %arg3[%c48, %c0_19] : memref<176x128xbf16, #tpu.memory_space<vmem>>, vector<128x128xbf16>
    %30 = vector.extract_strided_slice %26 {offsets = [1, 0], sizes = [1, 128], strides = [1, 1]} : vector<2x128xf32> to vector<1x128xf32>
    %31 = arith.truncf %30 : vector<1x128xf32> to vector<1x128xbf16>
    %cst_20 = arith.constant dense<0.000000e+00> : vector<1x128xf32>
    %32 = tpu.matmul %31, %29, %cst_20 {dimension_numbers = #tpu.dot_dimension_numbers<[1], [0], [0], [1], [0, 0, 1, 1], [], []>} : vector<1x128xbf16>, vector<128x128xbf16>, vector<1x128xf32> -> vector<1x128xf32>
    %c1 = arith.constant 1 : index
    %c0_21 = arith.constant 0 : index
    %33 = vector.load %arg4[%c1, %c0_21] : memref<2x128xf32, #tpu.memory_space<vmem>>, vector<1x128xf32>
    tpu.vector_store %arg4[%c1, %c0_21], %32 {strides = array<i32>} : memref<2x128xf32, #tpu.memory_space<vmem>>, vector<1x128xf32>,
    return
  }
}

</mosaic_0001>

<bundles_post_ra>
// kernel: tpu_custom_call.1
= control target key start
LH: loop header
LB: loop body
LE: loop exit
PB: predicated region body
PF: predicated region fallthrough
CT: control target
= control target key end

     0   :  { %9 = vsyncpa [#allocation3], 0  ;;  %s601_s0 = inlined_call_operand.vmem [shape: f32[1,128], index: 0, kind: input, shape index: {}]   ;;  %s602_s1 = inlined_call_operand.hbm [shape: f32[128,128], index: 1, kind: input, shape index: {}]   ;;  %s603_s2 = inlined_call_operand.vmem [shape: f32[104,1], index: 2, kind: input, shape index: {}]   ;;  %s604_s3 = inlined_call_operand.vmem [shape: bf16[176,128], index: 3, kind: input, shape index: {}]   ;;  %s605_s4 = inlined_call_operand.hbm [shape: f32[2,128], index: 4, kind: output, shape index: {}]  }
   0x1   :  { %10 = vsyncpa [#allocation4], 0  ;;  %s17_s17 = sshll.u32 %s602_s1, 4  ;;  %s487_s18 = smov [#allocation2]   ;;  %s18_s17 = int_to_ptr.hbm [resolvable:$true] %s17_s17 }
   0x2   :  { %s19_s19 = sshll.u32 %s487_s18, 4  ;;  %s488_s20 = smov 128   ;;  %s20_s19 = int_to_ptr.vmem [resolvable:$true] %s19_s19 }
   0x3   :  { %s489_s21 = smov 8  }
   0x4   :  { %25 = dma.hbm_to_vmem [thread:$0]  %s18_s17, 2048, %s20_s19, [#allocation3], %s488_s20, %s488_s20, %s489_s21  }
   0x5   :  { %483 = dma.done.wait [#allocation3], 2048  }
   0x6   :  { %484 = vsyncadd [#allocation3], 4294965248  ;;  %v490_v0 = vmov 0   ;;  %v50_v1 = vld [vmem:[#allocation2 + $0x78] sm:$0xff]  ;;  %v78_v2 = vld [vmem:[%s603_s2 + $0x10] sm:$0xff]  ;;  %vm153_vm0 = vcmask 261120  }
   0x7   :  { %432 = vset.pattern.permute.xlu0 %v490_v0  ;;  %433 = vset.pattern.permute.xlu1 %v490_v0  ;;  %v49_v3 = vld [vmem:[#allocation2 + $0x70] sm:$0xff]  ;;  %v48_v4 = vld [vmem:[#allocation2 + $0x68] sm:$0xff]  ;;  %v47_v6 = vld [vmem:[#allocation2 + $0x60] sm:$0xff]  ;;  %s491_s16 = smov [#allocation5]   ;;  %s348_s20 = sshll.u32 %s605_s4, 4  ;;  %s349_s20 = int_to_ptr.hbm [resolvable:$true] %s348_s20 }
   0x8   :  { %434 = vset.pattern.permute.xlu2 %v490_v0  ;;  %56 = vmatpush.msra.mxu0 %v50_v1  ;;  %v54_v5 = vld [vmem:[%s603_s2 + $0x30] sm:$0xff]  ;;  %v46_v7 = vld [vmem:[#allocation2 + $0x58] sm:$0xff]  ;;  %v76_v11 = vld [vmem:[%s603_s2] sm:$0xff]  ;;  %s346_s17 = sshll.u32 %s491_s16, 4  ;;  %s347_s17 = int_to_ptr.vmem [resolvable:$true] %s346_s17 }
   0x9   :  { %92 = vperm.xlu0 %432, %v78_v2   ;;  %199 = vmatpush.msra.mxu2 %v50_v1  ;;  %v79_v8 = vld [vmem:[%s603_s2 + $0x18] sm:$0xff]  ;;  %v45_v9 = vld [vmem:[#allocation2 + $0x50] sm:$0xff]  ;;  %v44_v12 = vld [vmem:[#allocation2 + $0x48] sm:$0xff] }
   0xa   :  { %411 = vmatpush.msra.mxu3 %v50_v1  ;;  %57 = vmatpush.msra.mxu0 %v49_v3  ;;  %v55_v10 = vld [vmem:[%s603_s2 + $0x38] sm:$0xff]  ;;  %v43_v13 = vld [vmem:[#allocation2 + $0x40] sm:$0xff]  ;;  %v77_v16 = vld [vmem:[%s603_s2 + $0x8] sm:$0xff] }
   0xb   :  { %117 = vperm.xlu1 %433, %v54_v5   ;;  %200 = vmatpush.msra.mxu2 %v49_v3  ;;  %v42_v14 = vld [vmem:[#allocation2 + $0x38] sm:$0xff]  ;;  %v52_v15 = vld [vmem:[%s603_s2 + $0x20] sm:$0xff]  ;;  %v41_v17 = vld [vmem:[#allocation2 + $0x30] sm:$0xff] }
   0xc   :  { %412 = vmatpush.msra.mxu3 %v49_v3  ;;  %58 = vmatpush.msra.mxu0 %v48_v4  ;;  %v53_v18 = vld [vmem:[%s603_s2 + $0x28] sm:$0xff]  ;;  %v39_v20 = vld [vmem:[#allocation2 + $0x20] sm:$0xff]  ;;  %v38_v21 = vld [vmem:[#allocation2 + $0x18] sm:$0xff] }
   0xd   :  { %201 = vmatpush.msra.mxu2 %v48_v4  ;;  %82 = vperm.xlu2 %434, %v76_v11   ;;  %v40_v19 = vld [vmem:[#allocation2 + $0x28] sm:$0xff]  ;;  %v136_v22 = vld [vmem:[%s603_s2 + $0x58] sm:$0xff]  ;;  %v135_v23 = vld [vmem:[%s603_s2 + $0x50] sm:$0xff] }
   0xe   :  { %413 = vmatpush.msra.mxu3 %v48_v4  ;;  %59 = vmatpush.msra.mxu0 %v47_v6  ;;  %v37_v24 = vld [vmem:[#allocation2 + $0x10] sm:$0xff]  ;;  %v133_v25 = vld [vmem:[%s603_s2 + $0x40] sm:$0xff]  ;;  %v36_v26 = vld [vmem:[#allocation2 + $0x8] sm:$0xff] }
   0xf   :  { %202 = vmatpush.msra.mxu2 %v47_v6  ;;  %v35_v27 = vld [vmem:[#allocation2] sm:$0xff]  ;;  %v134_v30 = vld [vmem:[%s603_s2 + $0x48] sm:$0xff]  ;;  %v410_v62 = vld [vmem:[%s604_s3 + $0x50] sm:$0xff] }
  0x10   :  { %414 = vmatpush.msra.mxu3 %v47_v6  ;;  %60 = vmatpush.msra.mxu0 %v46_v7  ;;  %v51_v28 = vld [vmem:[%s601_s0] sm:$0x1]  ;;  %v402_v56 = vld [vmem:[%s604_s3 + $0x8] sm:$0xff]  ;;  %v407_v3 = vld [vmem:[%s604_s3 + $0x38] sm:$0xff] }
  0x11   :  { %97 = vperm.xlu0 %432, %v79_v8   ;;  %203 = vmatpush.msra.mxu2 %v46_v7  ;;  %v235_v29 = vld [vmem:[%s603_s2 + $0x60] sm:$0x3]  ;;  %v409_v63 = vld [vmem:[%s604_s3 + $0x48] sm:$0xff]  ;;  %v406_v5 = vld [vmem:[%s604_s3 + $0x30] sm:$0xff] }
  0x12   :  { %61 = vmatpush.msra.mxu0 %v45_v9  ;;  %415 = vmatpush.msra.mxu3 %v46_v7  ;;  %v401_v55 = vld [vmem:[%s604_s3] sm:$0xff] }
  0x13   :  { %122 = vperm.xlu1 %433, %v55_v10   ;;  %204 = vmatpush.msra.mxu2 %v45_v9  ;;  %v408_v1 = vld [vmem:[%s604_s3 + $0x40] sm:$0xff]  ;;  %v405_v10 = vld [vmem:[%s604_s3 + $0x28] sm:$0xff] }
  0x14   :  { %62 = vmatpush.msra.mxu0 %v44_v12  ;;  %416 = vmatpush.msra.mxu3 %v45_v9 }
  0x15   :  { %205 = vmatpush.msra.mxu2 %v44_v12  ;;  %87 = vperm.xlu2 %434, %v77_v16  }
  0x16   :  { %63 = vmatpush.msra.mxu0 %v43_v13  ;;  %417 = vmatpush.msra.mxu3 %v44_v12 }
  0x17   :  { %206 = vmatpush.msra.mxu2 %v43_v13 }
  0x18   :  { %64 = vmatpush.msra.mxu0 %v42_v14  ;;  %418 = vmatpush.msra.mxu3 %v43_v13 }
  0x19   :  { %107 = vperm.xlu0 %432, %v52_v15   ;;  %207 = vmatpush.msra.mxu2 %v42_v14 }
  0x1a   :  { %65 = vmatpush.msra.mxu0 %v41_v17  ;;  %419 = vmatpush.msra.mxu3 %v42_v14 }
  0x1b   :  { %112 = vperm.xlu1 %433, %v53_v18   ;;  %208 = vmatpush.msra.mxu2 %v41_v17 }
  0x1c   :  { %66 = vmatpush.msra.mxu0 %v40_v19  ;;  %420 = vmatpush.msra.mxu3 %v41_v17 }
  0x1d   :  { %209 = vmatpush.msra.mxu2 %v40_v19  ;;  %191 = vperm.xlu2 %434, %v135_v23   ;;  %v403_v23 = vld [vmem:[%s604_s3 + $0x18] sm:$0xff] }
  0x1e   :  { %67 = vmatpush.msra.mxu0 %v39_v20  ;;  %421 = vmatpush.msra.mxu3 %v40_v19 }
  0x1f   :  { %210 = vmatpush.msra.mxu2 %v39_v20 }
  0x20   :  { %68 = vmatpush.msra.mxu0 %v38_v21  ;;  %422 = vmatpush.msra.mxu3 %v39_v20 }
  0x21   :  { %196 = vperm.xlu0 %432, %v136_v22   ;;  %211 = vmatpush.msra.mxu2 %v38_v21  ;;  %v404_v22 = vld [vmem:[%s604_s3 + $0x20] sm:$0xff] }
  0x22   :  { %69 = vmatpush.msra.mxu0 %v37_v24  ;;  %423 = vmatpush.msra.mxu3 %v38_v21  ;;  %v232_v21 = vld [vmem:[%s604_s3 + $0x10] sm:$0x1] }
  0x23   :  { %181 = vperm.xlu1 %433, %v133_v25   ;;  %212 = vmatpush.msra.mxu2 %v37_v24 }
  0x24   :  { %70 = vmatpush.msra.mxu0 %v36_v26  ;;  %424 = vmatpush.msra.mxu3 %v37_v24 }
  0x25   :  { %213 = vmatpush.msra.mxu2 %v36_v26  ;;  %186 = vperm.xlu2 %434, %v134_v30  }
  0x26   :  { %71 = vmatpush.msra.mxu0 %v35_v27  ;;  %425 = vmatpush.msra.mxu3 %v36_v26 }
  0x27   :  { %72 = vmatmul.f32.vlgmr.msra.gmra.mxu0 %v51_v28  ;;  %214 = vmatpush.msra.mxu2 %v35_v27 }
  0x28   :  { %426 = vmatpush.msra.mxu3 %v35_v27 }
  0x29   :  { %238 = vperm.xlu0 %432, %v235_v29  }
  0x67   :  { %v83_v33 = vpop.permute.xlu2 %82 }
  0x6f   :  { %v88_v38 = vpop.permute.xlu2 %87 }
  0x77   :  { %v192_v2 = vpop.permute.xlu2 %191 }
  0x7b   :  { %v93_v31 = vpop.permute.xlu0 %92 }
  0x7d   :  { %v118_v32 = vpop.permute.xlu1 %117 }
  0x7f   :  { %v187_v6 = vpop.permute.xlu2 %186 }
  0x83   :  { %v98_v34 = vpop.permute.xlu0 %97 }
  0x85   :  { %v123_v35 = vpop.permute.xlu1 %122 }
  0x8b   :  { %v108_v43 = vpop.permute.xlu0 %107 }
  0x8d   :  { %v113_v44 = vpop.permute.xlu1 %112 }
  0x93   :  { %v197_v8 = vpop.permute.xlu0 %196 }
  0x95   :  { %v182_v13 = vpop.permute.xlu1 %181 }
  0x9b   :  { %v239_v24 = vpop.permute.xlu0 %238 }
  0xa4   :  { %v73_v36 = vpop.f32.mrf.mxu0 }
  0xa5   :  { %v100_v37 = vperm.slane %v73_v36, 0 }
  0xa7   :  { %v103_v39 = vmul.f32 %v100_v37, %v93_v31  ;;  %v104_v40 = vmul.f32 %v100_v37, %v98_v34  ;;  %v101_v41 = vmul.f32 %v100_v37, %v83_v33  ;;  %v102_v42 = vmul.f32 %v100_v37, %v88_v38 }
  0xa9   :  { %v127_v45 = vadd.f32 %v118_v32, %v103_v39  ;;  %v128_v46 = vadd.f32 %v123_v35, %v104_v40  ;;  %v125_v47 = vadd.f32 %v108_v43, %v101_v41  ;;  %v126_v48 = vadd.f32 %v113_v44, %v102_v42 }
  0xab   :  { %v131_v49 = vmax.f32 %v127_v45, 0.0  ;;  %v132_v50 = vmax.f32 %v128_v46, 0.0  ;;  %v129_v52 = vmax.f32 %v125_v47, 0.0  ;;  %v130_v53 = vmax.f32 %v126_v48, 0.0 }
  0xad   :  { %v142_v51 = vpack.c.bf16 %v132_v50, %v131_v49  ;;  %v141_v54 = vpack.c.bf16 %v130_v53, %v129_v52 }
  0xaf   :  { %166 = vmatpush.bf16.msra.mxu1 %v142_v51 }
  0xb3   :  { %167 = vmatpush.bf16.msra.mxu1 %v141_v54 }
  0xb6   :  { %366 = vmatmul.msk.bf16.vlgmr.msra.gmra.mxu1 %vm153_vm0, %v401_v55 }
  0xb7   :  { %327 = vmatpush.bf16.msrb.mxu1 %v410_v62 }
  0xbb   :  { %328 = vmatpush.bf16.msrb.mxu1 %v409_v63 }
  0xbf   :  { %329 = vmatpush.bf16.msrb.mxu1 %v408_v1 }
  0xc3   :  { %330 = vmatpush.bf16.msrb.mxu1 %v407_v3 }
  0xc6   :  { %367 = vmatmul.msk.bf16.gmra.mxu1 %vm153_vm0, %v402_v56 }
  0xc7   :  { %331 = vmatpush.bf16.msrb.mxu1 %v406_v5 }
  0xcb   :  { %332 = vmatpush.bf16.msrb.mxu1 %v405_v10 }
  0xcf   :  { %333 = vmatpush.bf16.msrb.mxu1 %v404_v22 }
  0xd3   :  { %334 = vmatpush.bf16.msrb.mxu1 %v403_v23 }
 0x133   :  { %v169_v57 = vpop.f32.mrf.mxu1 }
 0x134   :  { %215 = vmatmul.f32.vlgmr.msra.gmra.mxu2 %v169_v57 }
 0x13b   :  { %v171_v58 = vpop.f32.mrf.mxu1 }
 0x13c   :  { %218 = vmatmul.f32.gmra.mxu2 %v171_v58 }
 0x143   :  { %v174_v59 = vpop.f32.mrf.mxu1 }
 0x144   :  { %221 = vmatmul.f32.gmra.mxu2 %v174_v59 }
 0x14b   :  { %v176_v60 = vpop.f32.mrf.mxu1 }
 0x14c   :  { %224 = vmatmul.f32.vlgmr.msra.gmra.mxu3 %v176_v60 }
 0x1b7   :  { %v216_v61 = vpop.f32.mrf.mxu2 }
 0x1b8   :  { %v217_v14 = vadd.f32 %v216_v61, %v182_v13 }
 0x1ba   :  { %v228_v19 = vmax.f32 %v217_v14, 0.0 }
 0x1bf   :  { %v219_v0 = vpop.f32.mrf.mxu2 }
 0x1c0   :  { %v220_v11 = vadd.f32 %v219_v0, %v187_v6 }
 0x1c2   :  { %v229_v17 = vmax.f32 %v220_v11, 0.0 }
 0x1c4   :  { %v233_v20 = vpack.c.bf16 %v229_v17, %v228_v19 }
 0x1c7   :  { %v222_v4 = vpop.f32.mrf.mxu2 }
 0x1c8   :  { %v223_v7 = vadd.f32 %v222_v4, %v192_v2 }
 0x1ca   :  { %v230_v15 = vmax.f32 %v223_v7, 0.0 }
 0x1cf   :  { %v225_v9 = vpop.f32.mrf.mxu3 }
 0x1d0   :  { %v226_v12 = vadd.f32 %v225_v9, %v197_v8 }
 0x1d2   :  { %v231_v16 = vmax.f32 %v226_v12, 0.0 }
 0x1d4   :  { %v234_v18 = vpack.c.bf16 %v231_v16, %v230_v15 }
 0x1d6   :  { %250 = vmatpush.bf16.msrb.mxu3 %v234_v18 }
 0x1da   :  { %251 = vmatpush.bf16.msrb.mxu3 %v233_v20 }
 0x1dd   :  { %368 = vmatmul.msk.bf16.vlgmr.msrb.gmra.mxu3 %vm153_vm0, %v232_v21 }
 0x260   :  { %v253_v25 = vpop.f32.mrf.mxu3 }
 0x261   :  { %v254_v26 = vadd.f32 %v253_v25, %v239_v24 }
 0x263   :  { %257 = vst [vmem:[#allocation5] sm:$0x1] %v254_v26  ;;  %v274_v27 = vpack.c.bf16 %v254_v26, %v254_v26 }
 0x265   :  { %v276_v28 = vshrl.u32 %v274_v27, 16 }
 0x267   :  { %335 = vmatmul.bf16.vlgmr.msrb.gmra.mxu1 %v276_v28 }
 0x268   :  { %v255_v29 = vpop.f32.mrf.mxu3 }
 0x2e4   :  { %v336_v30 = vpop.f32.mrf.mxu1 }
 0x2e5   :  { %340 = vst [vmem:[#allocation5 + $0x1] sm:$0x1] %v336_v30 }
 0x2e6   :  { %351 = dma.vmem_to_hbm [thread:$0]  %s347_s17, 32, %s349_s20, [#allocation4]  }
 0x2ec   :  { %v338_v31 = vpop.f32.mrf.mxu1 }
 0x2ed   :  { %485 = dma.done.wait [#allocation4], 32  }
 0x2ee   :  { %486 = vsyncadd [#allocation4], 4294967264 }
 0x2ef   :  { %356 = vsyncpa [#allocation3], 1 }
 0x2f0   :  { %357 = vsyncpa [#allocation4], 1 }

</bundles_post_ra>
